<compile_context>
chip_gen: v7x
topology: tpu7x:2x2x1
jax: 0.10.0
libtpu: 0.0.40
codegen_flags: <defaults>
</compile_context>

<pallas_src>
import jax
import jax.numpy as jnp
from jax.experimental import pallas as pl
from jax.experimental.pallas import tpu as pltpu


def _pos_embed_nchw_kernel(col_t_ref, row_t_ref, out_ref):
    # col_t_ref: (D, W)       transposed column (x) embeddings
    # row_t_ref: (D, tile_h)  transposed row    (y) embeddings for this H tile
    # out_ref:   (1, 2D, tile_h, W)  one NCHW output tile for one batch element
    d, w = col_t_ref.shape
    th = row_t_ref.shape[1]

    # x half (channels [0, D)): value depends only on (channel, w); replicate over H.
    out_ref[0, :d, :, :] = jnp.broadcast_to(col_t_ref[...][:, None, :], (d, th, w))
    # y half (channels [D, 2D)): value depends only on (channel, h); replicate over W.
    out_ref[0, d:, :, :] = jnp.broadcast_to(row_t_ref[...][:, :, None], (d, th, w))


def _pick_tile_h(h, w, two_d, itemsize, budget_bytes=4 * 1024 * 1024):
    """Largest legal tile_h: a multiple-of-8 divisor of h (or full h) whose
    (1, 2D, tile_h, W) block fits the per-block VMEM budget (x2 for double
    buffering stays well under the default scoped VMEM on v5e/v6e/v7x)."""
    def block_bytes(th):
        return two_d * th * w * itemsize

    if block_bytes(h) <= budget_bytes or h % 8 != 0:
        return h
    for th in range(h - 8, 0, -8):
        if h % th == 0 and block_bytes(th) <= budget_bytes:
            return th
    return h  # fallback: full extent (always legal)


def detr_learned_position_embedding(pixel_values, row_table, col_table):
    """pixel_values: (B, C, H, W); row/col_table: (50, D) learned embeddings.

    Returns pos of shape (B, 2D, H, W), matching the PyTorch module.
    """
    b = pixel_values.shape[0]
    h, w = pixel_values.shape[-2:]
    d = row_table.shape[-1]
    dtype = row_table.dtype

    # Embedding lookup with arange == slicing the first h / w rows. Transpose
    # the tiny tables so the kernel can emit NCHW tiles directly (negligible
    # cost: <= 50 x D elements).
    col_t = jnp.transpose(col_table[:w, :], (1, 0))  # (D, W)
    row_t = jnp.transpose(row_table[:h, :], (1, 0))  # (D, H)

    tile_h = _pick_tile_h(h, w, 2 * d, jnp.dtype(dtype).itemsize)

    return pl.pallas_call(
        _pos_embed_nchw_kernel,
        out_shape=jax.ShapeDtypeStruct((b, 2 * d, h, w), dtype),
        grid_spec=pltpu.PrefetchScalarGridSpec(
            num_scalar_prefetch=0,
            grid=(b, h // tile_h),
            in_specs=[
                # Tables live in VMEM (default space); constant index_map means
                # they are only DMA'd when the block index changes.
                pl.BlockSpec((d, w), lambda bi, hi: (0, 0)),
                pl.BlockSpec((d, tile_h), lambda bi, hi: (0, hi)),
            ],
            out_specs=pl.BlockSpec(
                (1, 2 * d, tile_h, w), lambda bi, hi: (bi, 0, hi, 0)
            ),
        ),
        compiler_params=pltpu.CompilerParams(
            dimension_semantics=("parallel", "parallel"),
        ),
    )(col_t, row_t)


def _reference(pixel_values, row_table, col_table):
    h, w = pixel_values.shape[-2:]
    b = pixel_values.shape[0]
    x_emb = col_table[:w]                       # (W, D)
    y_emb = row_table[:h]                       # (H, D)
    pos = jnp.concatenate(
        [
            jnp.broadcast_to(x_emb[None, :, :], (h, w, x_emb.shape[-1])),
            jnp.broadcast_to(y_emb[:, None, :], (h, w, y_emb.shape[-1])),
        ],
        axis=-1,
    )                                            # (H, W, 2D)
    pos = jnp.transpose(pos, (2, 0, 1))[None]    # (1, 2D, H, W)
    return jnp.broadcast_to(pos, (b,) + pos.shape[1:])


if __name__ == "__main__":
    key = jax.random.PRNGKey(0)
    k1, k2, k3 = jax.random.split(key, 3)

    B, C, H, W = 2, 4, 16, 16
    D = 32  # embedding_dim (small for the example; module default is 256)

    pixel_values = jax.random.normal(k1, (B, C, H, W), dtype=jnp.float32)
    # nn.Embedding(50, D) weight tables, deterministic init.
    row_table = jax.random.normal(k2, (50, D), dtype=jnp.float32)
    col_table = jax.random.normal(k3, (50, D), dtype=jnp.float32)

    out = detr_learned_position_embedding(pixel_values, row_table, col_table)
    out = jax.block_until_ready(out)

    ref = _reference(pixel_values, row_table, col_table)
    assert out.shape == (B, 2 * D, H, W), out.shape
    assert jnp.allclose(out, ref), "mismatch vs reference"

    print("KERNEL_OK")
</pallas_src>

<mosaic_0001>
module attributes {stable_mosaic.version = 11 : i64} {
  func.func @_pos_embed_nchw_kernel(%arg0: i32, %arg1: i32, %arg2: memref<32x16xf32, #tpu.memory_space<vmem>>, %arg3: memref<32x16xf32, #tpu.memory_space<vmem>>, %arg4: memref<1x64x16x16xf32, #tpu.memory_space<vmem>>) attributes {dimension_semantics = [#tpu.dimension_semantics<parallel>, #tpu.dimension_semantics<parallel>], iteration_bounds = array<i64: 2, 1>, scalar_prefetch = 0 : i64, scratch_operands = 0 : i64, tpu.core_type = #tpu.core_type<tc>, window_params = [{pipeline_mode = #tpu.pipeline_mode<synchronous>, transform_indices = @transform_0, window_bounds = array<i64: 32, 16>}, {transform_indices = @transform_1, window_bounds = array<i64: 32, 16>}, {transform_indices = @transform_2, window_bounds = array<i64: 1, 64, 16, 16>}]} {
    %c0 = arith.constant 0 : index
    %c0_0 = arith.constant 0 : index
    %0 = vector.load %arg2[%c0, %c0_0] : memref<32x16xf32, #tpu.memory_space<vmem>>, vector<32x16xf32>
    %1 = vector.shape_cast %0 : vector<32x16xf32> to vector<32x1x16xf32>
    %2 = vector.shape_cast %1 : vector<32x1x16xf32> to vector<32x1x16xf32>
    %3 = vector.broadcast %2 : vector<32x1x16xf32> to vector<32x16x16xf32>
    %c0_1 = arith.constant 0 : index
    %c0_2 = arith.constant 0 : index
    %c0_3 = arith.constant 0 : index
    %c0_4 = arith.constant 0 : index
    %4 = vector.load %arg4[%c0_1, %c0_2, %c0_3, %c0_4] : memref<1x64x16x16xf32, #tpu.memory_space<vmem>>, vector<1x32x16x16xf32>
    %5 = vector.shape_cast %4 : vector<1x32x16x16xf32> to vector<32x16x16xf32>
    %6 = vector.shape_cast %3 : vector<32x16x16xf32> to vector<1x32x16x16xf32>
    tpu.vector_store %arg4[%c0_1, %c0_2, %c0_3, %c0_4], %6 {strides = array<i32>} : memref<1x64x16x16xf32, #tpu.memory_space<vmem>>, vector<1x32x16x16xf32>,
    %c0_5 = arith.constant 0 : index
    %c0_6 = arith.constant 0 : index
    %7 = vector.load %arg3[%c0_5, %c0_6] : memref<32x16xf32, #tpu.memory_space<vmem>>, vector<32x16xf32>
    %8 = vector.shape_cast %7 : vector<32x16xf32> to vector<32x16x1xf32>
    %9 = vector.shape_cast %8 : vector<32x16x1xf32> to vector<32x16x1xf32>
    %10 = vector.broadcast %9 : vector<32x16x1xf32> to vector<32x16x16xf32>
    %c0_7 = arith.constant 0 : index
    %c32 = arith.constant 32 : index
    %c0_8 = arith.constant 0 : index
    %c0_9 = arith.constant 0 : index
    %11 = vector.load %arg4[%c0_7, %c32, %c0_8, %c0_9] : memref<1x64x16x16xf32, #tpu.memory_space<vmem>>, vector<1x32x16x16xf32>
    %12 = vector.shape_cast %11 : vector<1x32x16x16xf32> to vector<32x16x16xf32>
    %13 = vector.shape_cast %10 : vector<32x16x16xf32> to vector<1x32x16x16xf32>
    tpu.vector_store %arg4[%c0_7, %c32, %c0_8, %c0_9], %13 {strides = array<i32>} : memref<1x64x16x16xf32, #tpu.memory_space<vmem>>, vector<1x32x16x16xf32>,
    return
  }
  func.func @transform_0(%arg0: i32, %arg1: i32) -> (i32, i32) {
    %c0_i32 = arith.constant 0 : i32
    %c0_i32_0 = arith.constant 0 : i32
    %c0_i32_1 = arith.constant 0 : i32
    return %c0_i32, %c0_i32_0 : i32, i32
  }
  func.func @transform_1(%arg0: i32, %arg1: i32) -> (i32, i32) {
    %c0_i32 = arith.constant 0 : i32
    %c0_i32_0 = arith.constant 0 : i32
    return %c0_i32, %arg1 : i32, i32
  }
  func.func @transform_2(%arg0: i32, %arg1: i32) -> (i32, i32, i32, i32) {
    %c0_i32 = arith.constant 0 : i32
    %c0_i32_0 = arith.constant 0 : i32
    %c0_i32_1 = arith.constant 0 : i32
    return %arg0, %c0_i32, %arg1, %c0_i32_0 : i32, i32, i32, i32
  }
}

</mosaic_0001>

<bundles_post_ra>
// kernel: tpu_custom_call.1
= control target key start
LH: loop header
LB: loop body
LE: loop exit
PB: predicated region body
PF: predicated region fallthrough
CT: control target
= control target key end

     0   :  { %s1241_s9 = smov 0   ;;  %s1243_s10 = smov 0   ;;  %s1722_s0 = inlined_call_operand.vmem [shape: f32[32,16], index: 0, kind: input, shape index: {}]   ;;  %s1723_s1 = inlined_call_operand.vmem [shape: f32[32,16], index: 1, kind: input, shape index: {}]   ;;  %s1724_s2 = inlined_call_operand.vmem [shape: f32[2,64,16,16], index: 2, kind: output, shape index: {}]  }
   0x1   :  { %s1245_s11 = smov 0  }
   0x2 LB: > { %s24_s12 = sadd.s32 1, %s1219_s10  ;;  %p1102_p0 = scmp.ge.s32.totalorder %s1223_s11, 1  ;;  %s1223_s11 = sphi %s1245_s11, %s12_s11   ;;  %s1219_s10 = sphi %s1243_s10, %s1726_s10   ;;  %s1215_s9 = sphi %s1241_s9, %s1725_s9  }
   0x3   : > { %p26_p1 = scmp.ge.s32.totalorder %s24_s12, 2  ;;  %p125_p2 = scmp.lt.s32.totalorder %s1223_s11, 3 }
   0x5   : > { %s1728_s12 = smov (%p26_p1, %s24_s12), 0  ;;  %p126_p3 = pnand %p1102_p0, %p125_p2 }
   0x6   : > { %v176_v0 = vlaneseq (!%p126_p3)  ;;  %v164_v1 = vld [vmem:[%s1722_s0] sm:$0xff] (!%p126_p3)  ;;  %v165_v2 = vld [vmem:[%s1722_s0 + $0x8] sm:$0xff] (!%p126_p3)  ;;  %v166_v3 = vld [vmem:[%s1722_s0 + $0x10] sm:$0xff] (!%p126_p3)  ;;  %v1225_v6 = vmov (!%p126_p3), 1966171168   ;;  %p155_p4 = scmp.lt.s32.totalorder (!%p126_p3), %s1215_s9, 1 }
   0x7   : > { %129 = sbr.rel (%p126_p3) target bundleno = 255 (0xff), region = 28  ;;  %v167_v5 = vld [vmem:[%s1722_s0 + $0x18] sm:$0xff] (!%p126_p3)  ;;  %v174_v7 = vunpack.c.l.s4 (!%p126_p3), %v1225_v6  ;;  %v1278_v8 = vld [vmem:[%s1723_s1] sm:$0xff] (!%p126_p3)  ;;  %v172_v9 = vcombine.high (!%p126_p3), %v164_v1, %v164_v1  ;;  %v221_v10 = vcombine.high (!%p126_p3), %v165_v2, %v165_v2  ;;  %v270_v11 = vcombine.high (!%p126_p3), %v166_v3, %v166_v3 }
   0x8   : > { %v1270_v4 = vshrl.u32 (!%p126_p3), %v176_v0, 7  ;;  %v319_v16 = vcombine.high (!%p126_p3), %v167_v5, %v167_v5  ;;  %vm528_vm0 = vcmask (!%p126_p3), 130048  }
   0x9   : > { %v175_v13 = vunpack.c.0.s8 (!%p126_p3), %v174_v7 }
   0xa   : > { %v1281_v12 = vsub.s32 (!%p126_p3), 1, %v1270_v4  ;;  %v1284_v14 = vsub.s32 (!%p126_p3), 0, %v1270_v4  ;;  %v1287_v15 = vsub.s32 (!%p126_p3), 2, %v1270_v4  ;;  %v1290_v17 = vsub.s32 (!%p126_p3), 3, %v1270_v4 }
   0xb   : > { %v1293_v18 = vsub.s32 (!%p126_p3), 4, %v1270_v4  ;;  %v1296_v19 = vsub.s32 (!%p126_p3), 5, %v1270_v4  ;;  %v178_v21 = vsub.s32 (!%p126_p3), %v175_v13, %v1270_v4  ;;  %v1304_v23 = vsub.s32 (!%p126_p3), 6, %v1270_v4 }
   0xc   : > { %v611_v20 = vrot.slane (!%p126_p3), %v1278_v8, %v1281_v12  ;;  %v600_v22 = vrot.slane (!%p126_p3), %v1278_v8, %v1284_v14  ;;  %v622_v24 = vrot.slane (!%p126_p3), %v1278_v8, %v1287_v15  ;;  %v1310_v25 = vrot.slane (!%p126_p3), %v1278_v8, %v1290_v17 }
   0xd   : > { %v1314_v26 = vrot.slane (!%p126_p3), %v1278_v8, %v1293_v18  ;;  %v1318_v27 = vrot.slane (!%p126_p3), %v1278_v8, %v1296_v19  ;;  %v179_v28 = vrot.slane (!%p126_p3), %v164_v1, %v178_v21  ;;  %v186_v29 = vrot.slane (!%p126_p3), %v172_v9, %v178_v21 }
   0xe   : > { %613 = vbcast.lane.b32.xlu1 %v611_v20, 256  ;;  %v228_v30 = vrot.slane %v165_v2, %v178_v21  ;;  %v235_v31 = vrot.slane %v221_v10, %v178_v21  ;;  %v277_v32 = vrot.slane %v166_v3, %v178_v21  ;;  %v284_v33 = vrot.slane %v270_v11, %v178_v21  ;;  %s1730_s9 = smov (!%p155_p4, %s1215_s9), 1 }
   0xf   : > { %v326_v34 = vrot.slane %v167_v5, %v178_v21  ;;  %v333_v35 = vrot.slane %v319_v16, %v178_v21  ;;  %602 = vbcast.lane.b32.xlu0 %v600_v22, 256  ;;  %v187_v36 = vcombine.high %v179_v28, %v179_v28  ;;  %v188_v37 = vcombine.high %v186_v29, %v186_v29  ;;  %s1171_s23 = sshll.u32 %s1730_s9, 10 }
  0x10   : > { %v195_v38 = vrot.slane %v179_v28, %v178_v21  ;;  %v202_v39 = vrot.slane %v186_v29, %v178_v21  ;;  %v236_v40 = vcombine.high %v228_v30, %v228_v30  ;;  %v237_v41 = vcombine.high %v235_v31, %v235_v31  ;;  %s1356_s26 = scalar_lea.vmem %s1724_s2, %s1171_s23 }
  0x11   : > { %v244_v42 = vrot.slane %v228_v30, %v178_v21  ;;  %v1321_v43 = vrot.slane %v235_v31, %v178_v21  ;;  %v209_v44 = vrot.slane %v187_v36, %v178_v21  ;;  %v216_v45 = vrot.slane %v188_v37, %v178_v21 }
  0x12   : > { %v217_v46 = vcombine.high %v195_v38, %v195_v38  ;;  %v218_v47 = vcombine.high %v202_v39, %v202_v39  ;;  %617 = vbcast.lane.b32.xlu1 %v611_v20, 264  ;;  %v258_v48 = vrot.slane %v236_v40, %v178_v21  ;;  %v265_v49 = vrot.slane %v237_v41, %v178_v21 }
  0x13   : > { %v266_v50 = vcombine.high %v244_v42, %v244_v42  ;;  %v267_v51 = vcombine.high %v1321_v43, %v1321_v43  ;;  %606 = vbcast.lane.b32.xlu0 %v600_v22, 264  ;;  %v219_v52 = vcombine.high %v209_v44, %v209_v44  ;;  %v220_v53 = vcombine.high %v216_v45, %v216_v45 }
  0x14   : > { %v285_v54 = vcombine.high %v277_v32, %v277_v32  ;;  %v286_v55 = vcombine.high %v284_v33, %v284_v33  ;;  %v268_v56 = vcombine.high %v258_v48, %v258_v48  ;;  %v269_v57 = vcombine.high %v265_v49, %v265_v49 }
  0x15   : > { %v293_v58 = vrot.slane %v277_v32, %v178_v21  ;;  %v1330_v59 = vrot.slane %v284_v33, %v178_v21  ;;  %v334_v62 = vcombine.high %v326_v34, %v326_v34  ;;  %v335_v63 = vcombine.high %v333_v35, %v333_v35 }
  0x16   : > { %v307_v60 = vrot.slane %v285_v54, %v178_v21  ;;  %v1332_v61 = vrot.slane %v286_v55, %v178_v21  ;;  %628 = vbcast.lane.b32.xlu1 %v622_v24, 264  ;;  %v1337_v2 = vrot.slane %v326_v34, %v178_v21  ;;  %v1339_v3 = vrot.slane %v333_v35, %v178_v21 }
  0x17   : > { %v315_v0 = vcombine.high %v293_v58, %v293_v58  ;;  %v316_v1 = vcombine.high %v1330_v59, %v1330_v59  ;;  %624 = vbcast.lane.b32.xlu0 %v622_v24, 256  ;;  %v1343_v7 = vrot.slane %v334_v62, %v178_v21  ;;  %v1345_v9 = vrot.slane %v335_v63, %v178_v21  ;;  %v595_v63 = vld [vmem:[%s1723_s1 + $0x10] sm:$0xff] }
  0x18   : > { %v317_v5 = vcombine.high %v307_v60, %v307_v60  ;;  %v318_v6 = vcombine.high %v1332_v61, %v1332_v61  ;;  %v364_v10 = vcombine.high %v1337_v2, %v1337_v2  ;;  %v365_v11 = vcombine.high %v1339_v3, %v1339_v3 }
  0x19   : > { %v371_v13 = vrot.slane %v195_v38, %v1284_v14  ;;  %v375_v16 = vrot.slane %v209_v44, %v1284_v14  ;;  %v366_v20 = vcombine.high %v1343_v7, %v1343_v7  ;;  %v367_v21 = vcombine.high %v1345_v9, %v1345_v9 }
  0x1a   : > { %v379_v22 = vrot.slane %v217_v46, %v1284_v14  ;;  %v383_v24 = vrot.slane %v219_v52, %v1284_v14  ;;  %639 = vbcast.lane.b32.xlu1 %v1310_v25, 264  ;;  %v387_v28 = vrot.slane %v202_v39, %v1284_v14  ;;  %v391_v29 = vrot.slane %v216_v45, %v1284_v14 }
  0x1b   : > { %v395_v30 = vrot.slane %v218_v47, %v1284_v14  ;;  %v399_v31 = vrot.slane %v220_v53, %v1284_v14  ;;  %529 = vst.msk [vmem:[%s1356_s26] sm:$0xff] %vm528_vm0, %v371_v13  ;;  %530 = vst.msk [vmem:[%s1356_s26 + $0x8] sm:$0xff] %vm528_vm0, %v371_v13  ;;  %635 = vbcast.lane.b32.xlu0 %v1310_v25, 256  ;;  %v403_v32 = vrot.slane %v244_v42, %v1284_v14 }
  0x1c   : > { %531 = vst.msk [vmem:[%s1356_s26 + $0x10] sm:$0xff] %vm528_vm0, %v375_v16  ;;  %532 = vst.msk [vmem:[%s1356_s26 + $0x18] sm:$0xff] %vm528_vm0, %v375_v16  ;;  %v407_v33 = vrot.slane %v258_v48, %v1284_v14  ;;  %v411_v34 = vrot.slane %v266_v50, %v1284_v14  ;;  %v415_v35 = vrot.slane %v268_v56, %v1284_v14  ;;  %v1531_v55 = vsub.s32 7, %v1270_v4  ;;  %v594_v56 = vld [vmem:[%s1723_s1 + $0x8] sm:$0xff] }
  0x1d   : > { %533 = vst.msk [vmem:[%s1356_s26 + $0x20] sm:$0xff] %vm528_vm0, %v379_v22  ;;  %534 = vst.msk [vmem:[%s1356_s26 + $0x28] sm:$0xff] %vm528_vm0, %v379_v22  ;;  %v419_v25 = vrot.slane %v1321_v43, %v1284_v14  ;;  %v423_v36 = vrot.slane %v265_v49, %v1284_v14  ;;  %v427_v37 = vrot.slane %v267_v51, %v1284_v14 }
  0x1e   : > { %535 = vst.msk [vmem:[%s1356_s26 + $0x30] sm:$0xff] %vm528_vm0, %v383_v24  ;;  %536 = vst.msk [vmem:[%s1356_s26 + $0x38] sm:$0xff] %vm528_vm0, %v383_v24  ;;  %v431_v38 = vrot.slane %v269_v57, %v1284_v14  ;;  %v435_v39 = vrot.slane %v293_v58, %v1284_v14  ;;  %v439_v40 = vrot.slane %v307_v60, %v1284_v14  ;;  %650 = vbcast.lane.b32.xlu1 %v1314_v26, 264 }
  0x1f   : > { %537 = vst.msk [vmem:[%s1356_s26 + $0x40] sm:$0xff] %vm528_vm0, %v387_v28  ;;  %538 = vst.msk [vmem:[%s1356_s26 + $0x48] sm:$0xff] %vm528_vm0, %v387_v28  ;;  %v443_v41 = vrot.slane %v315_v0, %v1284_v14  ;;  %v447_v42 = vrot.slane %v317_v5, %v1284_v14  ;;  %v451_v43 = vrot.slane %v1330_v59, %v1284_v14  ;;  %646 = vbcast.lane.b32.xlu0 %v1314_v26, 256 }
  0x20   : > { %539 = vst.msk [vmem:[%s1356_s26 + $0x50] sm:$0xff] %vm528_vm0, %v391_v29  ;;  %540 = vst.msk [vmem:[%s1356_s26 + $0x58] sm:$0xff] %vm528_vm0, %v391_v29  ;;  %v455_v44 = vrot.slane %v1332_v61, %v1284_v14  ;;  %v459_v45 = vrot.slane %v316_v1, %v1284_v14  ;;  %v463_v46 = vrot.slane %v318_v6, %v1284_v14 }
  0x21   : > { %541 = vst.msk [vmem:[%s1356_s26 + $0x60] sm:$0xff] %vm528_vm0, %v395_v30  ;;  %542 = vst.msk [vmem:[%s1356_s26 + $0x68] sm:$0xff] %vm528_vm0, %v395_v30  ;;  %v467_v47 = vrot.slane %v1337_v2, %v1284_v14  ;;  %v471_v48 = vrot.slane %v1343_v7, %v1284_v14  ;;  %v475_v49 = vrot.slane %v364_v10, %v1284_v14  ;;  %v596_v10 = vld [vmem:[%s1723_s1 + $0x18] sm:$0xff] }
  0x22   : > { %543 = vst.msk [vmem:[%s1356_s26 + $0x70] sm:$0xff] %vm528_vm0, %v399_v31  ;;  %544 = vst.msk [vmem:[%s1356_s26 + $0x78] sm:$0xff] %vm528_vm0, %v399_v31  ;;  %v479_v50 = vrot.slane %v366_v20, %v1284_v14  ;;  %v483_v26 = vrot.slane %v1339_v3, %v1284_v14  ;;  %v487_v51 = vrot.slane %v1345_v9, %v1284_v14  ;;  %661 = vbcast.lane.b32.xlu1 %v1318_v27, 264 }
  0x23   : > { %545 = vst.msk [vmem:[%s1356_s26 + $0x80] sm:$0xff] %vm528_vm0, %v403_v32  ;;  %546 = vst.msk [vmem:[%s1356_s26 + $0x88] sm:$0xff] %vm528_vm0, %v403_v32  ;;  %v491_v52 = vrot.slane %v365_v11, %v1284_v14  ;;  %v495_v53 = vrot.slane %v367_v21, %v1284_v14  ;;  %v666_v54 = vrot.slane %v1278_v8, %v1304_v23  ;;  %657 = vbcast.lane.b32.xlu0 %v1318_v27, 256 }
  0x24   : > { %547 = vst.msk [vmem:[%s1356_s26 + $0x90] sm:$0xff] %vm528_vm0, %v407_v33  ;;  %548 = vst.msk [vmem:[%s1356_s26 + $0x98] sm:$0xff] %vm528_vm0, %v407_v33  ;;  %v677_v4 = vrot.slane %v1278_v8, %v1531_v55  ;;  %v688_v57 = vrot.slane %v594_v56, %v1284_v14  ;;  %v699_v58 = vrot.slane %v594_v56, %v1281_v12 }
  0x25   : > { %549 = vst.msk [vmem:[%s1356_s26 + $0xa0] sm:$0xff] %vm528_vm0, %v411_v34  ;;  %550 = vst.msk [vmem:[%s1356_s26 + $0xa8] sm:$0xff] %vm528_vm0, %v411_v34  ;;  %v710_v27 = vrot.slane %v594_v56, %v1287_v15  ;;  %v721_v8 = vrot.slane %v594_v56, %v1290_v17  ;;  %v732_v59 = vrot.slane %v594_v56, %v1293_v18 }
  0x26   : > { %551 = vst.msk [vmem:[%s1356_s26 + $0xb0] sm:$0xff] %vm528_vm0, %v415_v35  ;;  %552 = vst.msk [vmem:[%s1356_s26 + $0xb8] sm:$0xff] %vm528_vm0, %v415_v35  ;;  %672 = vbcast.lane.b32.xlu1 %v666_v54, 264  ;;  %v743_v60 = vrot.slane %v594_v56, %v1296_v19  ;;  %v754_v61 = vrot.slane %v594_v56, %v1304_v23  ;;  %v765_v62 = vrot.slane %v594_v56, %v1531_v55 }
  0x27   : > { %553 = vst.msk [vmem:[%s1356_s26 + $0xc0] sm:$0xff] %vm528_vm0, %v419_v25  ;;  %554 = vst.msk [vmem:[%s1356_s26 + $0xc8] sm:$0xff] %vm528_vm0, %v419_v25  ;;  %668 = vbcast.lane.b32.xlu0 %v666_v54, 256  ;;  %v776_v0 = vrot.slane %v595_v63, %v1284_v14  ;;  %v787_v1 = vrot.slane %v595_v63, %v1281_v12  ;;  %v798_v2 = vrot.slane %v595_v63, %v1287_v15 }
  0x28   : > { %555 = vst.msk [vmem:[%s1356_s26 + $0xd0] sm:$0xff] %vm528_vm0, %v423_v36  ;;  %556 = vst.msk [vmem:[%s1356_s26 + $0xd8] sm:$0xff] %vm528_vm0, %v423_v36  ;;  %v809_v3 = vrot.slane %v595_v63, %v1290_v17  ;;  %v820_v5 = vrot.slane %v595_v63, %v1293_v18  ;;  %v831_v6 = vrot.slane %v595_v63, %v1296_v19 }
  0x29   : > { %557 = vst.msk [vmem:[%s1356_s26 + $0xe0] sm:$0xff] %vm528_vm0, %v427_v37  ;;  %558 = vst.msk [vmem:[%s1356_s26 + $0xe8] sm:$0xff] %vm528_vm0, %v427_v37  ;;  %v842_v7 = vrot.slane %v595_v63, %v1304_v23  ;;  %v853_v9 = vrot.slane %v595_v63, %v1531_v55  ;;  %v864_v11 = vrot.slane %v596_v10, %v1284_v14 }
  0x2a   : > { %559 = vst.msk [vmem:[%s1356_s26 + $0xf0] sm:$0xff] %vm528_vm0, %v431_v38  ;;  %560 = vst.msk [vmem:[%s1356_s26 + $0xf8] sm:$0xff] %vm528_vm0, %v431_v38  ;;  %683 = vbcast.lane.b32.xlu1 %v677_v4, 264  ;;  %v875_v13 = vrot.slane %v596_v10, %v1281_v12  ;;  %v886_v16 = vrot.slane %v596_v10, %v1287_v15  ;;  %v897_v20 = vrot.slane %v596_v10, %v1290_v17 }
  0x2b   : > { %561 = vst.msk [vmem:[%s1356_s26 + $0x100] sm:$0xff] %vm528_vm0, %v435_v39  ;;  %562 = vst.msk [vmem:[%s1356_s26 + $0x108] sm:$0xff] %vm528_vm0, %v435_v39  ;;  %679 = vbcast.lane.b32.xlu0 %v677_v4, 256  ;;  %v908_v14 = vrot.slane %v596_v10, %v1293_v18  ;;  %v919_v21 = vrot.slane %v596_v10, %v1296_v19  ;;  %v930_v17 = vrot.slane %v596_v10, %v1304_v23 }
  0x2c   : > { %563 = vst.msk [vmem:[%s1356_s26 + $0x110] sm:$0xff] %vm528_vm0, %v439_v40  ;;  %564 = vst.msk [vmem:[%s1356_s26 + $0x118] sm:$0xff] %vm528_vm0, %v439_v40  ;;  %v941_v19 = vrot.slane %v596_v10, %v1531_v55 }
  0x2d   : > { %565 = vst.msk [vmem:[%s1356_s26 + $0x120] sm:$0xff] %vm528_vm0, %v443_v41  ;;  %566 = vst.msk [vmem:[%s1356_s26 + $0x128] sm:$0xff] %vm528_vm0, %v443_v41 }
  0x2e   : > { %567 = vst.msk [vmem:[%s1356_s26 + $0x130] sm:$0xff] %vm528_vm0, %v447_v42  ;;  %568 = vst.msk [vmem:[%s1356_s26 + $0x138] sm:$0xff] %vm528_vm0, %v447_v42  ;;  %694 = vbcast.lane.b32.xlu1 %v688_v57, 264 }
  0x2f   : > { %569 = vst.msk [vmem:[%s1356_s26 + $0x140] sm:$0xff] %vm528_vm0, %v451_v43  ;;  %570 = vst.msk [vmem:[%s1356_s26 + $0x148] sm:$0xff] %vm528_vm0, %v451_v43  ;;  %690 = vbcast.lane.b32.xlu0 %v688_v57, 256 }
  0x30   : > { %571 = vst.msk [vmem:[%s1356_s26 + $0x150] sm:$0xff] %vm528_vm0, %v455_v44  ;;  %572 = vst.msk [vmem:[%s1356_s26 + $0x158] sm:$0xff] %vm528_vm0, %v455_v44 }
  0x31   : > { %573 = vst.msk [vmem:[%s1356_s26 + $0x160] sm:$0xff] %vm528_vm0, %v459_v45  ;;  %574 = vst.msk [vmem:[%s1356_s26 + $0x168] sm:$0xff] %vm528_vm0, %v459_v45 }
  0x32   : > { %575 = vst.msk [vmem:[%s1356_s26 + $0x170] sm:$0xff] %vm528_vm0, %v463_v46  ;;  %576 = vst.msk [vmem:[%s1356_s26 + $0x178] sm:$0xff] %vm528_vm0, %v463_v46  ;;  %705 = vbcast.lane.b32.xlu1 %v699_v58, 264 }
  0x33   : > { %577 = vst.msk [vmem:[%s1356_s26 + $0x180] sm:$0xff] %vm528_vm0, %v467_v47  ;;  %578 = vst.msk [vmem:[%s1356_s26 + $0x188] sm:$0xff] %vm528_vm0, %v467_v47  ;;  %701 = vbcast.lane.b32.xlu0 %v699_v58, 256 }
  0x34   : > { %579 = vst.msk [vmem:[%s1356_s26 + $0x190] sm:$0xff] %vm528_vm0, %v471_v48  ;;  %580 = vst.msk [vmem:[%s1356_s26 + $0x198] sm:$0xff] %vm528_vm0, %v471_v48 }
  0x35   : > { %581 = vst.msk [vmem:[%s1356_s26 + $0x1a0] sm:$0xff] %vm528_vm0, %v475_v49  ;;  %582 = vst.msk [vmem:[%s1356_s26 + $0x1a8] sm:$0xff] %vm528_vm0, %v475_v49 }
  0x36   : > { %583 = vst.msk [vmem:[%s1356_s26 + $0x1b0] sm:$0xff] %vm528_vm0, %v479_v50  ;;  %584 = vst.msk [vmem:[%s1356_s26 + $0x1b8] sm:$0xff] %vm528_vm0, %v479_v50  ;;  %716 = vbcast.lane.b32.xlu1 %v710_v27, 264 }
  0x37   : > { %585 = vst.msk [vmem:[%s1356_s26 + $0x1c0] sm:$0xff] %vm528_vm0, %v483_v26  ;;  %586 = vst.msk [vmem:[%s1356_s26 + $0x1c8] sm:$0xff] %vm528_vm0, %v483_v26  ;;  %712 = vbcast.lane.b32.xlu0 %v710_v27, 256 }
  0x38   : > { %587 = vst.msk [vmem:[%s1356_s26 + $0x1d0] sm:$0xff] %vm528_vm0, %v487_v51  ;;  %588 = vst.msk [vmem:[%s1356_s26 + $0x1d8] sm:$0xff] %vm528_vm0, %v487_v51 }
  0x39   : > { %589 = vst.msk [vmem:[%s1356_s26 + $0x1e0] sm:$0xff] %vm528_vm0, %v491_v52  ;;  %590 = vst.msk [vmem:[%s1356_s26 + $0x1e8] sm:$0xff] %vm528_vm0, %v491_v52 }
  0x3a   : > { %591 = vst.msk [vmem:[%s1356_s26 + $0x1f0] sm:$0xff] %vm528_vm0, %v495_v53  ;;  %592 = vst.msk [vmem:[%s1356_s26 + $0x1f8] sm:$0xff] %vm528_vm0, %v495_v53  ;;  %727 = vbcast.lane.b32.xlu1 %v721_v8, 264 }
  0x3b   : > { %723 = vbcast.lane.b32.xlu0 %v721_v8, 256 }
  0x3e   : > { %738 = vbcast.lane.b32.xlu1 %v732_v59, 264 }
  0x3f   : > { %734 = vbcast.lane.b32.xlu0 %v732_v59, 256 }
  0x42   : > { %749 = vbcast.lane.b32.xlu1 %v743_v60, 264 }
  0x43   : > { %745 = vbcast.lane.b32.xlu0 %v743_v60, 256 }
  0x46   : > { %760 = vbcast.lane.b32.xlu1 %v754_v61, 264 }
  0x47   : > { %756 = vbcast.lane.b32.xlu0 %v754_v61, 256 }
  0x4a   : > { %771 = vbcast.lane.b32.xlu1 %v765_v62, 264 }
  0x4b   : > { %767 = vbcast.lane.b32.xlu0 %v765_v62, 256 }
  0x4e   : > { %782 = vbcast.lane.b32.xlu1 %v776_v0, 264 }
  0x4f   : > { %778 = vbcast.lane.b32.xlu0 %v776_v0, 256 }
  0x52   : > { %793 = vbcast.lane.b32.xlu1 %v787_v1, 264 }
  0x53   : > { %789 = vbcast.lane.b32.xlu0 %v787_v1, 256 }
  0x56   : > { %804 = vbcast.lane.b32.xlu1 %v798_v2, 264 }
  0x57   : > { %800 = vbcast.lane.b32.xlu0 %v798_v2, 256 }
  0x5a   : > { %815 = vbcast.lane.b32.xlu1 %v809_v3, 264 }
  0x5b   : > { %811 = vbcast.lane.b32.xlu0 %v809_v3, 256 }
  0x5e   : > { %826 = vbcast.lane.b32.xlu1 %v820_v5, 264 }
  0x5f   : > { %822 = vbcast.lane.b32.xlu0 %v820_v5, 256 }
  0x62   : > { %837 = vbcast.lane.b32.xlu1 %v831_v6, 264 }
  0x63   : > { %833 = vbcast.lane.b32.xlu0 %v831_v6, 256 }
  0x66   : > { %848 = vbcast.lane.b32.xlu1 %v842_v7, 264 }
  0x67   : > { %844 = vbcast.lane.b32.xlu0 %v842_v7, 256 }
  0x6a   : > { %859 = vbcast.lane.b32.xlu1 %v853_v9, 264 }
  0x6b   : > { %855 = vbcast.lane.b32.xlu0 %v853_v9, 256 }
  0x6e   : > { %870 = vbcast.lane.b32.xlu1 %v864_v11, 264 }
  0x6f   : > { %866 = vbcast.lane.b32.xlu0 %v864_v11, 256 }
  0x72   : > { %881 = vbcast.lane.b32.xlu1 %v875_v13, 264 }
  0x73   : > { %877 = vbcast.lane.b32.xlu0 %v875_v13, 256 }
  0x76   : > { %892 = vbcast.lane.b32.xlu1 %v886_v16, 264 }
  0x77   : > { %888 = vbcast.lane.b32.xlu0 %v886_v16, 256 }
  0x7a   : > { %903 = vbcast.lane.b32.xlu1 %v897_v20, 264 }
  0x7b   : > { %899 = vbcast.lane.b32.xlu0 %v897_v20, 256 }
  0x7e   : > { %914 = vbcast.lane.b32.xlu1 %v908_v14, 264 }
  0x7f   : > { %910 = vbcast.lane.b32.xlu0 %v908_v14, 256 }
  0x80   : > { %v614_v12 = vpop.permute.xlu1 %613 }
  0x81   : > { %1107 = vst.msk [vmem:[%s1356_s26 + $0x210] sm:$0xff] %vm528_vm0, %v614_v12  ;;  %v603_v15 = vpop.permute.xlu0 %602 }
  0x82   : > { %1105 = vst.msk [vmem:[%s1356_s26 + $0x200] sm:$0xff] %vm528_vm0, %v603_v15  ;;  %925 = vbcast.lane.b32.xlu1 %v919_v21, 264 }
  0x83   : > { %921 = vbcast.lane.b32.xlu0 %v919_v21, 256 }
  0x84   : > { %v618_v22 = vpop.permute.xlu1 %617 }
  0x85   : > { %1108 = vst.msk [vmem:[%s1356_s26 + $0x218] sm:$0xff] %vm528_vm0, %v618_v22  ;;  %v607_v18 = vpop.permute.xlu0 %606 }
  0x86   : > { %1106 = vst.msk [vmem:[%s1356_s26 + $0x208] sm:$0xff] %vm528_vm0, %v607_v18  ;;  %936 = vbcast.lane.b32.xlu1 %v930_v17, 264 }
  0x87   : > { %932 = vbcast.lane.b32.xlu0 %v930_v17, 256 }
  0x88   : > { %v629_v24 = vpop.permute.xlu1 %628 }
  0x89   : > { %1110 = vst.msk [vmem:[%s1356_s26 + $0x228] sm:$0xff] %vm528_vm0, %v629_v24  ;;  %v625_v23 = vpop.permute.xlu0 %624 }
  0x8a   : > { %1109 = vst.msk [vmem:[%s1356_s26 + $0x220] sm:$0xff] %vm528_vm0, %v625_v23  ;;  %947 = vbcast.lane.b32.xlu1 %v941_v19, 264 }
  0x8b   : > { %943 = vbcast.lane.b32.xlu0 %v941_v19, 256 }
  0x8c   : > { %v640_v28 = vpop.permute.xlu1 %639 }
  0x8d   : > { %1112 = vst.msk [vmem:[%s1356_s26 + $0x238] sm:$0xff] %vm528_vm0, %v640_v28  ;;  %v636_v29 = vpop.permute.xlu0 %635 }
  0x8e   : > { %1111 = vst.msk [vmem:[%s1356_s26 + $0x230] sm:$0xff] %vm528_vm0, %v636_v29 }
  0x90   : > { %v651_v30 = vpop.permute.xlu1 %650 }
  0x91   : > { %1114 = vst.msk [vmem:[%s1356_s26 + $0x248] sm:$0xff] %vm528_vm0, %v651_v30  ;;  %v647_v31 = vpop.permute.xlu0 %646 }
  0x92   : > { %1113 = vst.msk [vmem:[%s1356_s26 + $0x240] sm:$0xff] %vm528_vm0, %v647_v31 }
  0x94   : > { %v662_v32 = vpop.permute.xlu1 %661 }
  0x95   : > { %1116 = vst.msk [vmem:[%s1356_s26 + $0x258] sm:$0xff] %vm528_vm0, %v662_v32  ;;  %v658_v33 = vpop.permute.xlu0 %657 }
  0x96   : > { %1115 = vst.msk [vmem:[%s1356_s26 + $0x250] sm:$0xff] %vm528_vm0, %v658_v33 }
  0x98   : > { %v673_v34 = vpop.permute.xlu1 %672 }
  0x99   : > { %1118 = vst.msk [vmem:[%s1356_s26 + $0x268] sm:$0xff] %vm528_vm0, %v673_v34  ;;  %v669_v35 = vpop.permute.xlu0 %668 }
  0x9a   : > { %1117 = vst.msk [vmem:[%s1356_s26 + $0x260] sm:$0xff] %vm528_vm0, %v669_v35 }
  0x9c   : > { %v684_v25 = vpop.permute.xlu1 %683 }
  0x9d   : > { %1120 = vst.msk [vmem:[%s1356_s26 + $0x278] sm:$0xff] %vm528_vm0, %v684_v25  ;;  %v680_v36 = vpop.permute.xlu0 %679 }
  0x9e   : > { %1119 = vst.msk [vmem:[%s1356_s26 + $0x270] sm:$0xff] %vm528_vm0, %v680_v36 }
  0xa0   : > { %v695_v37 = vpop.permute.xlu1 %694 }
  0xa1   : > { %1122 = vst.msk [vmem:[%s1356_s26 + $0x288] sm:$0xff] %vm528_vm0, %v695_v37  ;;  %v691_v38 = vpop.permute.xlu0 %690 }
  0xa2   : > { %1121 = vst.msk [vmem:[%s1356_s26 + $0x280] sm:$0xff] %vm528_vm0, %v691_v38 }
  0xa4   : > { %v706_v39 = vpop.permute.xlu1 %705 }
  0xa5   : > { %1124 = vst.msk [vmem:[%s1356_s26 + $0x298] sm:$0xff] %vm528_vm0, %v706_v39  ;;  %v702_v40 = vpop.permute.xlu0 %701 }
  0xa6   : > { %1123 = vst.msk [vmem:[%s1356_s26 + $0x290] sm:$0xff] %vm528_vm0, %v702_v40 }
  0xa8   : > { %v717_v41 = vpop.permute.xlu1 %716 }
  0xa9   : > { %1126 = vst.msk [vmem:[%s1356_s26 + $0x2a8] sm:$0xff] %vm528_vm0, %v717_v41  ;;  %v713_v42 = vpop.permute.xlu0 %712 }
  0xaa   : > { %1125 = vst.msk [vmem:[%s1356_s26 + $0x2a0] sm:$0xff] %vm528_vm0, %v713_v42 }
  0xac   : > { %v728_v43 = vpop.permute.xlu1 %727 }
  0xad   : > { %1128 = vst.msk [vmem:[%s1356_s26 + $0x2b8] sm:$0xff] %vm528_vm0, %v728_v43  ;;  %v724_v44 = vpop.permute.xlu0 %723 }
  0xae   : > { %1127 = vst.msk [vmem:[%s1356_s26 + $0x2b0] sm:$0xff] %vm528_vm0, %v724_v44 }
  0xb0   : > { %v739_v45 = vpop.permute.xlu1 %738 }
  0xb1   : > { %1130 = vst.msk [vmem:[%s1356_s26 + $0x2c8] sm:$0xff] %vm528_vm0, %v739_v45  ;;  %v735_v46 = vpop.permute.xlu0 %734 }
  0xb2   : > { %1129 = vst.msk [vmem:[%s1356_s26 + $0x2c0] sm:$0xff] %vm528_vm0, %v735_v46 }
  0xb4   : > { %v750_v47 = vpop.permute.xlu1 %749 }
  0xb5   : > { %1132 = vst.msk [vmem:[%s1356_s26 + $0x2d8] sm:$0xff] %vm528_vm0, %v750_v47  ;;  %v746_v48 = vpop.permute.xlu0 %745 }
  0xb6   : > { %1131 = vst.msk [vmem:[%s1356_s26 + $0x2d0] sm:$0xff] %vm528_vm0, %v746_v48 }
  0xb8   : > { %v761_v49 = vpop.permute.xlu1 %760 }
  0xb9   : > { %1134 = vst.msk [vmem:[%s1356_s26 + $0x2e8] sm:$0xff] %vm528_vm0, %v761_v49  ;;  %v757_v50 = vpop.permute.xlu0 %756 }
  0xba   : > { %1133 = vst.msk [vmem:[%s1356_s26 + $0x2e0] sm:$0xff] %vm528_vm0, %v757_v50 }
  0xbc   : > { %v772_v26 = vpop.permute.xlu1 %771 }
  0xbd   : > { %1136 = vst.msk [vmem:[%s1356_s26 + $0x2f8] sm:$0xff] %vm528_vm0, %v772_v26  ;;  %v768_v51 = vpop.permute.xlu0 %767 }
  0xbe   : > { %1135 = vst.msk [vmem:[%s1356_s26 + $0x2f0] sm:$0xff] %vm528_vm0, %v768_v51 }
  0xc0   : > { %v783_v52 = vpop.permute.xlu1 %782 }
  0xc1   : > { %1138 = vst.msk [vmem:[%s1356_s26 + $0x308] sm:$0xff] %vm528_vm0, %v783_v52  ;;  %v779_v53 = vpop.permute.xlu0 %778 }
  0xc2   : > { %1137 = vst.msk [vmem:[%s1356_s26 + $0x300] sm:$0xff] %vm528_vm0, %v779_v53 }
  0xc4   : > { %v794_v54 = vpop.permute.xlu1 %793 }
  0xc5   : > { %1140 = vst.msk [vmem:[%s1356_s26 + $0x318] sm:$0xff] %vm528_vm0, %v794_v54  ;;  %v790_v55 = vpop.permute.xlu0 %789 }
  0xc6   : > { %1139 = vst.msk [vmem:[%s1356_s26 + $0x310] sm:$0xff] %vm528_vm0, %v790_v55 }
  0xc8   : > { %v805_v4 = vpop.permute.xlu1 %804 }
  0xc9   : > { %1142 = vst.msk [vmem:[%s1356_s26 + $0x328] sm:$0xff] %vm528_vm0, %v805_v4  ;;  %v801_v56 = vpop.permute.xlu0 %800 }
  0xca   : > { %1141 = vst.msk [vmem:[%s1356_s26 + $0x320] sm:$0xff] %vm528_vm0, %v801_v56 }
  0xcc   : > { %v816_v57 = vpop.permute.xlu1 %815 }
  0xcd   : > { %1144 = vst.msk [vmem:[%s1356_s26 + $0x338] sm:$0xff] %vm528_vm0, %v816_v57  ;;  %v812_v58 = vpop.permute.xlu0 %811 }
  0xce   : > { %1143 = vst.msk [vmem:[%s1356_s26 + $0x330] sm:$0xff] %vm528_vm0, %v812_v58 }
  0xd0   : > { %v827_v27 = vpop.permute.xlu1 %826 }
  0xd1   : > { %1146 = vst.msk [vmem:[%s1356_s26 + $0x348] sm:$0xff] %vm528_vm0, %v827_v27  ;;  %v823_v8 = vpop.permute.xlu0 %822 }
  0xd2   : > { %1145 = vst.msk [vmem:[%s1356_s26 + $0x340] sm:$0xff] %vm528_vm0, %v823_v8 }
  0xd4   : > { %v838_v59 = vpop.permute.xlu1 %837 }
  0xd5   : > { %1148 = vst.msk [vmem:[%s1356_s26 + $0x358] sm:$0xff] %vm528_vm0, %v838_v59  ;;  %v834_v60 = vpop.permute.xlu0 %833 }
  0xd6   : > { %1147 = vst.msk [vmem:[%s1356_s26 + $0x350] sm:$0xff] %vm528_vm0, %v834_v60 }
  0xd8   : > { %v849_v61 = vpop.permute.xlu1 %848 }
  0xd9   : > { %1150 = vst.msk [vmem:[%s1356_s26 + $0x368] sm:$0xff] %vm528_vm0, %v849_v61  ;;  %v845_v62 = vpop.permute.xlu0 %844 }
  0xda   : > { %1149 = vst.msk [vmem:[%s1356_s26 + $0x360] sm:$0xff] %vm528_vm0, %v845_v62 }
  0xdc   : > { %v860_v63 = vpop.permute.xlu1 %859 }
  0xdd   : > { %1152 = vst.msk [vmem:[%s1356_s26 + $0x378] sm:$0xff] %vm528_vm0, %v860_v63  ;;  %v856_v0 = vpop.permute.xlu0 %855 }
  0xde   : > { %1151 = vst.msk [vmem:[%s1356_s26 + $0x370] sm:$0xff] %vm528_vm0, %v856_v0 }
  0xe0   : > { %v871_v1 = vpop.permute.xlu1 %870 }
  0xe1   : > { %1154 = vst.msk [vmem:[%s1356_s26 + $0x388] sm:$0xff] %vm528_vm0, %v871_v1  ;;  %v867_v2 = vpop.permute.xlu0 %866 }
  0xe2   : > { %1153 = vst.msk [vmem:[%s1356_s26 + $0x380] sm:$0xff] %vm528_vm0, %v867_v2 }
  0xe4   : > { %v882_v3 = vpop.permute.xlu1 %881 }
  0xe5   : > { %1156 = vst.msk [vmem:[%s1356_s26 + $0x398] sm:$0xff] %vm528_vm0, %v882_v3  ;;  %v878_v5 = vpop.permute.xlu0 %877 }
  0xe6   : > { %1155 = vst.msk [vmem:[%s1356_s26 + $0x390] sm:$0xff] %vm528_vm0, %v878_v5 }
  0xe8   : > { %v893_v6 = vpop.permute.xlu1 %892 }
  0xe9   : > { %1158 = vst.msk [vmem:[%s1356_s26 + $0x3a8] sm:$0xff] %vm528_vm0, %v893_v6  ;;  %v889_v7 = vpop.permute.xlu0 %888 }
  0xea   : > { %1157 = vst.msk [vmem:[%s1356_s26 + $0x3a0] sm:$0xff] %vm528_vm0, %v889_v7 }
  0xec   : > { %v904_v9 = vpop.permute.xlu1 %903 }
  0xed   : > { %1160 = vst.msk [vmem:[%s1356_s26 + $0x3b8] sm:$0xff] %vm528_vm0, %v904_v9  ;;  %v900_v10 = vpop.permute.xlu0 %899 }
  0xee   : > { %1159 = vst.msk [vmem:[%s1356_s26 + $0x3b0] sm:$0xff] %vm528_vm0, %v900_v10 }
  0xf0   : > { %v915_v11 = vpop.permute.xlu1 %914 }
  0xf1   : > { %1162 = vst.msk [vmem:[%s1356_s26 + $0x3c8] sm:$0xff] %vm528_vm0, %v915_v11  ;;  %v911_v13 = vpop.permute.xlu0 %910 }
  0xf2   : > { %1161 = vst.msk [vmem:[%s1356_s26 + $0x3c0] sm:$0xff] %vm528_vm0, %v911_v13 }
  0xf4   : > { %v926_v16 = vpop.permute.xlu1 %925 }
  0xf5   : > { %1164 = vst.msk [vmem:[%s1356_s26 + $0x3d8] sm:$0xff] %vm528_vm0, %v926_v16  ;;  %v922_v20 = vpop.permute.xlu0 %921 }
  0xf6   : > { %1163 = vst.msk [vmem:[%s1356_s26 + $0x3d0] sm:$0xff] %vm528_vm0, %v922_v20 }
  0xf8   : > { %v937_v14 = vpop.permute.xlu1 %936 }
  0xf9   : > { %1166 = vst.msk [vmem:[%s1356_s26 + $0x3e8] sm:$0xff] %vm528_vm0, %v937_v14  ;;  %v933_v21 = vpop.permute.xlu0 %932 }
  0xfa   : > { %1165 = vst.msk [vmem:[%s1356_s26 + $0x3e0] sm:$0xff] %vm528_vm0, %v933_v21 }
  0xfc   : > { %v948_v12 = vpop.permute.xlu1 %947 }
  0xfd   : > { %1168 = vst.msk [vmem:[%s1356_s26 + $0x3f8] sm:$0xff] %vm528_vm0, %v948_v12  ;;  %v944_v15 = vpop.permute.xlu0 %943 }
  0xfe   : > { %1167 = vst.msk [vmem:[%s1356_s26 + $0x3f0] sm:$0xff] %vm528_vm0, %v944_v15 }
  0xff PF: > { %s12_s11 = sadd.s32 1, %s1223_s11   ;;  %s1725_s9 = smov %s1219_s10 }
 0x100   : > { %p9_p5 = scmp.ge.s32.totalorder %s12_s11, 4   ;;  %s1726_s10 = smov %s1728_s12 }
 0x102   :  { %11 = sbr.rel (!%p9_p5) target bundleno = 2 (0x2), region = 59 }

</bundles_post_ra>
